<compile_context>
chip_gen: v5e
topology: v5e:2x2
jax: 0.10.0
libtpu: 0.0.40
codegen_flags: <defaults>
</compile_context>

<pallas_src>
import math

import jax
import jax.numpy as jnp
import numpy as np
from jax.experimental import pallas as pl
from jax.experimental.pallas import tpu as pltpu

_EPS = 1e-12  # matches torch.nn.functional.normalize default eps


def _round_up(x, m):
    return ((x + m - 1) // m) * m


def _arc_subcenter_kernel(x_ref, w_ref, inv_ref, o_ref):
    """x_ref: (TB, D); w_ref: (k, D, TC); inv_ref: (k, TC); o_ref: (TB, TC)."""
    # L2-normalize the feature tile:
    #   x / max(||x||, eps) == x * rsqrt(max(||x||^2, eps^2))
    x = x_ref[...].astype(jnp.float32)
    ssq = jnp.sum(x * x, axis=-1, keepdims=True)
    xn = x * jax.lax.rsqrt(jnp.maximum(ssq, _EPS * _EPS))
    xn = xn.astype(w_ref.dtype)  # bf16 operands when the weight streams as bf16

    inv = inv_ref[...]  # (k, TC) inverse class-center norms, f32

    k = w_ref.shape[0]
    cos_max = None
    for j in range(k):  # k is small & static -> unrolled MXU matmuls
        cj = jnp.dot(xn, w_ref[j], preferred_element_type=jnp.float32)  # (TB, TC)
        cj = cj * inv[j:j + 1, :]
        cos_max = cj if cos_max is None else jnp.maximum(cos_max, cj)

    o_ref[...] = cos_max.astype(o_ref.dtype)


def arc_margin_product_subcenter(features, weight, out_features, k, *,
                                 block_b=256, block_c=512, use_bf16=True):
    """features: (B, in_features); weight: (out_features*k, in_features).

    Returns (B, out_features) f32 cosines (max over the k subcenters), matching
    ArcMarginProductSubcenter.forward.
    """
    B, D = features.shape
    C = out_features
    assert weight.shape == (C * k, D), weight.shape

    # ---- one-time weight prep (glue). In training, store the parameter in the
    # (k, D, C) layout and cache inv_wnorm per weight update so this relayout
    # (an extra HBM copy of the weight) does not run per microbatch. ----
    # w_kdc[j, :, c] == weight[c*k + j, :]  -> matches view(-1, C, k).max(dim=2)
    w_kdc = weight.reshape(C, k, D).transpose(1, 2, 0).astype(jnp.float32)
    inv_wnorm = jax.lax.rsqrt(
        jnp.maximum(jnp.sum(w_kdc * w_kdc, axis=1), _EPS * _EPS))  # (k, C), f32

    # ---- tile sizing + padding (lane = 128, sublane = 8 alignment) ----
    TB = block_b if B > block_b else _round_up(B, 8)
    TC = block_c if C > block_c else _round_up(C, 128)
    Bp, Cp, Dp = _round_up(B, TB), _round_up(C, TC), _round_up(D, 128)

    feats = features.astype(jnp.float32)
    if (Bp, Dp) != (B, D):
        feats = jnp.pad(feats, ((0, Bp - B), (0, Dp - D)))
    if (Dp, Cp) != (D, C):
        w_kdc = jnp.pad(w_kdc, ((0, 0), (0, Dp - D), (0, Cp - C)))
        inv_wnorm = jnp.pad(inv_wnorm, ((0, 0), (0, Cp - C)))
    if use_bf16:
        # bf16 operands, f32 MXU accumulation; halves weight HBM traffic.
        w_kdc = w_kdc.astype(jnp.bfloat16)

    grid = (Cp // TC, Bp // TB)  # C outer, B inner: weight tile reused across B

    out = pl.pallas_call(
        _arc_subcenter_kernel,
        out_shape=jax.ShapeDtypeStruct((Bp, Cp), jnp.float32),
        grid_spec=pltpu.PrefetchScalarGridSpec(
            num_scalar_prefetch=0,
            grid=grid,
            in_specs=[
                pl.BlockSpec((TB, Dp), lambda ic, ib: (ib, 0)),
                pl.BlockSpec((k, Dp, TC), lambda ic, ib: (0, 0, ic)),
                pl.BlockSpec((k, TC), lambda ic, ib: (0, ic)),
            ],
            out_specs=pl.BlockSpec((TB, TC), lambda ic, ib: (ib, ic)),
        ),
        compiler_params=pltpu.CompilerParams(
            # Each output block is written exactly once -> both axes parallel
            # (lets v7x shard tiles across its 2 TensorCores; no-op on v5e/v6e).
            dimension_semantics=("parallel", "parallel"),
            # Tiles (<= ~8 MiB incl. double-buffering) fit comfortably; 32 MiB
            # is safe on v5e (128 MiB phys), v6e (128 MiB) and v7x (64 MiB).
            vmem_limit_bytes=32 * 1024 * 1024,
        ),
    )(feats, w_kdc, inv_wnorm)

    if (Bp, Cp) != (B, C):
        out = out[:B, :C]
    return out


def _reference(features, weight, out_features, k):
    """Plain-JAX reference mirroring the torch forward exactly (f32)."""
    eps = 1e-12
    fn = features / jnp.maximum(
        jnp.linalg.norm(features, axis=1, keepdims=True), eps)
    wn = weight / jnp.maximum(
        jnp.linalg.norm(weight, axis=1, keepdims=True), eps)
    cos_all = fn @ wn.T                                   # (B, C*k)
    cos_all = cos_all.reshape(-1, out_features, k)
    return jnp.max(cos_all, axis=2)


if __name__ == "__main__":
    B = 8             # batch
    in_features = 32  # embedding dim
    out_features = 16
    k = 3

    key = jax.random.PRNGKey(0)
    kx, kw = jax.random.split(key)

    features = jax.random.normal(kx, (B, in_features), dtype=jnp.float32)

    # Deterministic init matching reset_parameters(): uniform(-stdv, stdv)
    stdv = 1.0 / math.sqrt(in_features)
    weight = jax.random.uniform(
        kw, (out_features * k, in_features),
        minval=-stdv, maxval=stdv, dtype=jnp.float32)

    ref = _reference(features, weight, out_features, k)

    # f32 operand path (tight-ish check; rsqrt/MXU accumulation order differ
    # slightly from the plain-XLA reference).
    out_f32 = jax.block_until_ready(
        arc_margin_product_subcenter(features, weight, out_features, k,
                                     use_bf16=False))
    np.testing.assert_allclose(np.asarray(out_f32), np.asarray(ref),
                               rtol=2e-3, atol=2e-3)

    # Default bf16-operand / f32-accumulation path (MXU-native on v6e/v7x).
    out_bf16 = jax.block_until_ready(
        arc_margin_product_subcenter(features, weight, out_features, k,
                                     use_bf16=True))
    np.testing.assert_allclose(np.asarray(out_bf16), np.asarray(ref),
                               rtol=0, atol=2e-2)

    print("KERNEL_OK")
</pallas_src>

<mosaic_0001>
module attributes {stable_mosaic.version = 11 : i64} {
  func.func @_arc_subcenter_kernel(%arg0: i32, %arg1: i32, %arg2: memref<8x128xf32, #tpu.memory_space<vmem>>, %arg3: memref<3x128x128xf32, #tpu.memory_space<vmem>>, %arg4: memref<3x128xf32, #tpu.memory_space<vmem>>, %arg5: memref<8x128xf32, #tpu.memory_space<vmem>>) attributes {dimension_semantics = [#tpu.dimension_semantics<parallel>, #tpu.dimension_semantics<parallel>], iteration_bounds = array<i64: 1, 1>, scalar_prefetch = 0 : i64, scratch_operands = 0 : i64, tpu.core_type = #tpu.core_type<tc>, window_params = [{transform_indices = @transform_0, window_bounds = array<i64: 8, 128>}, {transform_indices = @transform_1, window_bounds = array<i64: 3, 128, 128>}, {transform_indices = @transform_2, window_bounds = array<i64: 3, 128>}, {transform_indices = @transform_3, window_bounds = array<i64: 8, 128>}]} {
    %c0 = arith.constant 0 : index
    %c0_0 = arith.constant 0 : index
    %0 = vector.load %arg2[%c0, %c0_0] : memref<8x128xf32, #tpu.memory_space<vmem>>, vector<8x128xf32>
    %1 = arith.mulf %0, %0 : vector<8x128xf32>
    %cst = arith.constant dense<0.000000e+00> : vector<8xf32>
    %2 = vector.multi_reduction <add>, %1, %cst [1] : vector<8x128xf32> to vector<8xf32>
    %3 = vector.shape_cast %2 : vector<8xf32> to vector<8x1xf32>
    %cst_1 = arith.constant 1.000000e-24 : f32
    %4 = vector.broadcast %cst_1 : f32 to vector<8x1xf32>
    %5 = arith.maximumf %3, %4 : vector<8x1xf32>
    %6 = math.rsqrt %5 : vector<8x1xf32>
    %7 = vector.broadcast %6 : vector<8x1xf32> to vector<8x128xf32>
    %8 = arith.mulf %0, %7 : vector<8x128xf32>
    %c0_2 = arith.constant 0 : index
    %c0_3 = arith.constant 0 : index
    %9 = vector.load %arg4[%c0_2, %c0_3] : memref<3x128xf32, #tpu.memory_space<vmem>>, vector<3x128xf32>
    %c0_4 = arith.constant 0 : index
    %c0_5 = arith.constant 0 : index
    %c0_6 = arith.constant 0 : index
    %10 = vector.load %arg3[%c0_4, %c0_5, %c0_6] : memref<3x128x128xf32, #tpu.memory_space<vmem>>, vector<1x128x128xf32>
    %11 = vector.shape_cast %10 : vector<1x128x128xf32> to vector<128x128xf32>
    %cst_7 = arith.constant dense<0.000000e+00> : vector<8x128xf32>
    %12 = tpu.matmul %8, %11, %cst_7 {dimension_numbers = #tpu.dot_dimension_numbers<[1], [0], [0], [1], [0, 0, 1, 1], [], []>} : vector<8x128xf32>, vector<128x128xf32>, vector<8x128xf32> -> vector<8x128xf32>
    %13 = vector.extract_strided_slice %9 {offsets = [0, 0], sizes = [1, 128], strides = [1, 1]} : vector<3x128xf32> to vector<1x128xf32>
    %14 = vector.broadcast %13 : vector<1x128xf32> to vector<8x128xf32>
    %15 = arith.mulf %12, %14 : vector<8x128xf32>
    %c1 = arith.constant 1 : index
    %c0_8 = arith.constant 0 : index
    %c0_9 = arith.constant 0 : index
    %16 = vector.load %arg3[%c1, %c0_8, %c0_9] : memref<3x128x128xf32, #tpu.memory_space<vmem>>, vector<1x128x128xf32>
    %17 = vector.shape_cast %16 : vector<1x128x128xf32> to vector<128x128xf32>
    %cst_10 = arith.constant dense<0.000000e+00> : vector<8x128xf32>
    %18 = tpu.matmul %8, %17, %cst_10 {dimension_numbers = #tpu.dot_dimension_numbers<[1], [0], [0], [1], [0, 0, 1, 1], [], []>} : vector<8x128xf32>, vector<128x128xf32>, vector<8x128xf32> -> vector<8x128xf32>
    %19 = vector.extract_strided_slice %9 {offsets = [1, 0], sizes = [1, 128], strides = [1, 1]} : vector<3x128xf32> to vector<1x128xf32>
    %20 = vector.broadcast %19 : vector<1x128xf32> to vector<8x128xf32>
    %21 = arith.mulf %18, %20 : vector<8x128xf32>
    %22 = arith.maximumf %15, %21 : vector<8x128xf32>
    %c2 = arith.constant 2 : index
    %c0_11 = arith.constant 0 : index
    %c0_12 = arith.constant 0 : index
    %23 = vector.load %arg3[%c2, %c0_11, %c0_12] : memref<3x128x128xf32, #tpu.memory_space<vmem>>, vector<1x128x128xf32>
    %24 = vector.shape_cast %23 : vector<1x128x128xf32> to vector<128x128xf32>
    %cst_13 = arith.constant dense<0.000000e+00> : vector<8x128xf32>
    %25 = tpu.matmul %8, %24, %cst_13 {dimension_numbers = #tpu.dot_dimension_numbers<[1], [0], [0], [1], [0, 0, 1, 1], [], []>} : vector<8x128xf32>, vector<128x128xf32>, vector<8x128xf32> -> vector<8x128xf32>
    %26 = vector.extract_strided_slice %9 {offsets = [2, 0], sizes = [1, 128], strides = [1, 1]} : vector<3x128xf32> to vector<1x128xf32>
    %27 = vector.broadcast %26 : vector<1x128xf32> to vector<8x128xf32>
    %28 = arith.mulf %25, %27 : vector<8x128xf32>
    %29 = arith.maximumf %22, %28 : vector<8x128xf32>
    %c0_14 = arith.constant 0 : index
    %c0_15 = arith.constant 0 : index
    %30 = vector.load %arg5[%c0_14, %c0_15] : memref<8x128xf32, #tpu.memory_space<vmem>>, vector<8x128xf32>
    tpu.vector_store %arg5[%c0_14, %c0_15], %29 {strides = array<i32>} : memref<8x128xf32, #tpu.memory_space<vmem>>, vector<8x128xf32>,
    return
  }
  func.func @transform_0(%arg0: i32, %arg1: i32) -> (i32, i32) {
    %c0_i32 = arith.constant 0 : i32
    %c0_i32_0 = arith.constant 0 : i32
    return %arg1, %c0_i32 : i32, i32
  }
  func.func @transform_1(%arg0: i32, %arg1: i32) -> (i32, i32, i32) {
    %c0_i32 = arith.constant 0 : i32
    %c0_i32_0 = arith.constant 0 : i32
    %c0_i32_1 = arith.constant 0 : i32
    return %c0_i32, %c0_i32_0, %arg0 : i32, i32, i32
  }
  func.func @transform_2(%arg0: i32, %arg1: i32) -> (i32, i32) {
    %c0_i32 = arith.constant 0 : i32
    %c0_i32_0 = arith.constant 0 : i32
    return %c0_i32, %arg0 : i32, i32
  }
  func.func @transform_3(%arg0: i32, %arg1: i32) -> (i32, i32) {
    %c0_i32 = arith.constant 0 : i32
    return %arg1, %arg0 : i32, i32
  }
}

</mosaic_0001>

<bundles_post_ra>
// kernel: tpu_custom_call.1
= control target key start
LH: loop header
LB: loop body
LE: loop exit
PB: predicated region body
PF: predicated region fallthrough
CT: control target
= control target key end

     0   :  { %8 = vsyncpa [#allocation3], 0  ;;  %s365_s0 = inlined_call_operand.hbm [shape: f32[8,128], index: 0, kind: input, shape index: {}]   ;;  %s366_s1 = inlined_call_operand.hbm [shape: f32[3,128,128], index: 1, kind: input, shape index: {}]   ;;  %s367_s2 = inlined_call_operand.hbm [shape: f32[3,128], index: 2, kind: input, shape index: {}]   ;;  %s368_s3 = inlined_call_operand.hbm [shape: f32[8,128], index: 3, kind: output, shape index: {}]  }
   0x1   :  { %9 = vsyncpa [#allocation6], 0  ;;  %s26_s14 = sshll.u32 %s366_s1, 4  ;;  %s27_s14 = int_to_ptr.hbm [resolvable:$true] %s26_s14 }
   0x2   :  { %10 = vsyncpa [#allocation4], 0  ;;  %s322_s15 = smov [#allocation5]   ;;  %s16_s19 = sshll.u32 %s365_s0, 4  ;;  %s17_s19 = int_to_ptr.hbm [resolvable:$true] %s16_s19 }
   0x3   :  { %s28_s16 = sshll.u32 %s322_s15, 4  ;;  %s323_s20 = smov 128   ;;  %s29_s16 = int_to_ptr.vmem [resolvable:$true] %s28_s16 }
   0x4   :  { %s324_s21 = smov 8   ;;  %s325_s22 = smov [#allocation2]  }
   0x5   :  { %34 = dma.hbm_to_vmem [thread:$0]  %s27_s14, 6144, %s29_s16, [#allocation6], %s323_s20, %s323_s20, %s324_s21  }
   0x6   :  { %s18_s23 = sshll.u32 %s325_s22, 4  ;;  %s40_s26 = sshll.u32 %s367_s2, 4  ;;  %s19_s23 = int_to_ptr.vmem [resolvable:$true] %s18_s23  ;;  %s41_s26 = int_to_ptr.hbm [resolvable:$true] %s40_s26 }
   0x7   :  { %21 = dma.hbm_to_vmem [thread:$0]  %s17_s19, 128, %s19_s23, [#allocation3]  }
   0x8   :  { %s326_s1 = smov [#allocation7]  }
   0x9   :  { %s42_s27 = sshll.u32 %s326_s1, 4  ;;  %s43_s27 = int_to_ptr.vmem [resolvable:$true] %s42_s27 }
   0xa   :  { %45 = dma.hbm_to_vmem [thread:$0]  %s41_s26, 64, %s43_s27, [#allocation6]  }
   0xb   :  { %316 = dma.done.wait [#allocation3], 128  }
   0xc   :  { %317 = vsyncadd [#allocation3], 4294967168 }
   0xd   :  { %318 = dma.done.wait [#allocation6], 6208  }
   0xe   :  { %319 = vsyncadd [#allocation6], 4294961088  ;;  %v357_v0 = vld [vmem:[#allocation2] sm:$0xff]  ;;  %v89_v5 = vld [vmem:[#allocation5 + $0x70] sm:$0xff]  ;;  %s327_s0 = smov [#allocation8]   ;;  %s201_s30 = sshll.u32 %s368_s3, 4  ;;  %s202_s30 = int_to_ptr.hbm [resolvable:$true] %s201_s30 }
   0xf   :  { %v90_v1 = vld [vmem:[#allocation5 + $0x78] sm:$0xff]  ;;  %v59_v3 = vmul.f32 %v357_v0, %v357_v0  ;;  %v128_v6 = vld [vmem:[#allocation5 + $0xf0] sm:$0xff]  ;;  %v88_v8 = vld [vmem:[#allocation5 + $0x68] sm:$0xff]  ;;  %s199_s2 = sshll.u32 %s327_s0, 4  ;;  %s200_s2 = int_to_ptr.vmem [resolvable:$true] %s199_s2 }
  0x10   :  { %v129_v2 = vld [vmem:[#allocation5 + $0xf8] sm:$0xff]  ;;  %91 = vmatpush.msra.mxu0 %v90_v1  ;;  %v168_v7 = vld [vmem:[#allocation5 + $0x170] sm:$0xff]  ;;  %v127_v9 = vld [vmem:[#allocation5 + $0xe8] sm:$0xff] }
  0x11   :  { %130 = vmatpush.msra.mxu1 %v129_v2  ;;  %v169_v4 = vld [vmem:[#allocation5 + $0x178] sm:$0xff]  ;;  %60 = vadd.xlane.f32.xlu0 %v59_v3  ;;  %v167_v10 = vld [vmem:[#allocation5 + $0x168] sm:$0xff]  ;;  %v87_v11 = vld [vmem:[#allocation5 + $0x60] sm:$0xff] }
  0x12   :  { %170 = vmatpush.msra.mxu2 %v169_v4  ;;  %92 = vmatpush.msra.mxu0 %v89_v5  ;;  %v126_v12 = vld [vmem:[#allocation5 + $0xe0] sm:$0xff]  ;;  %v86_v14 = vld [vmem:[#allocation5 + $0x58] sm:$0xff]  ;;  %v85_v17 = vld [vmem:[#allocation5 + $0x50] sm:$0xff] }
  0x13   :  { %131 = vmatpush.msra.mxu1 %v128_v6  ;;  %v166_v13 = vld [vmem:[#allocation5 + $0x160] sm:$0xff]  ;;  %v125_v15 = vld [vmem:[#allocation5 + $0xd8] sm:$0xff]  ;;  %v124_v18 = vld [vmem:[#allocation5 + $0xd0] sm:$0xff] }
  0x14   :  { %171 = vmatpush.msra.mxu2 %v168_v7  ;;  %93 = vmatpush.msra.mxu0 %v88_v8  ;;  %v165_v16 = vld [vmem:[#allocation5 + $0x158] sm:$0xff]  ;;  %v164_v19 = vld [vmem:[#allocation5 + $0x150] sm:$0xff]  ;;  %v84_v20 = vld [vmem:[#allocation5 + $0x48] sm:$0xff] }
  0x15   :  { %132 = vmatpush.msra.mxu1 %v127_v9  ;;  %v123_v21 = vld [vmem:[#allocation5 + $0xc8] sm:$0xff]  ;;  %v83_v23 = vld [vmem:[#allocation5 + $0x40] sm:$0xff]  ;;  %v82_v26 = vld [vmem:[#allocation5 + $0x38] sm:$0xff] }
  0x16   :  { %172 = vmatpush.msra.mxu2 %v167_v10  ;;  %94 = vmatpush.msra.mxu0 %v87_v11  ;;  %v163_v22 = vld [vmem:[#allocation5 + $0x148] sm:$0xff]  ;;  %v122_v24 = vld [vmem:[#allocation5 + $0xc0] sm:$0xff]  ;;  %v121_v27 = vld [vmem:[#allocation5 + $0xb8] sm:$0xff] }
  0x17   :  { %133 = vmatpush.msra.mxu1 %v126_v12  ;;  %v162_v25 = vld [vmem:[#allocation5 + $0x140] sm:$0xff]  ;;  %v161_v28 = vld [vmem:[#allocation5 + $0x138] sm:$0xff]  ;;  %v81_v29 = vld [vmem:[#allocation5 + $0x30] sm:$0xff] }
  0x18   :  { %173 = vmatpush.msra.mxu2 %v166_v13  ;;  %95 = vmatpush.msra.mxu0 %v86_v14  ;;  %v120_v30 = vld [vmem:[#allocation5 + $0xb0] sm:$0xff]  ;;  %v80_v32 = vld [vmem:[#allocation5 + $0x28] sm:$0xff]  ;;  %v79_v35 = vld [vmem:[#allocation5 + $0x20] sm:$0xff] }
  0x19   :  { %134 = vmatpush.msra.mxu1 %v125_v15  ;;  %v160_v31 = vld [vmem:[#allocation5 + $0x130] sm:$0xff]  ;;  %v119_v33 = vld [vmem:[#allocation5 + $0xa8] sm:$0xff]  ;;  %v118_v36 = vld [vmem:[#allocation5 + $0xa0] sm:$0xff] }
  0x1a   :  { %174 = vmatpush.msra.mxu2 %v165_v16  ;;  %96 = vmatpush.msra.mxu0 %v85_v17  ;;  %v159_v34 = vld [vmem:[#allocation5 + $0x128] sm:$0xff]  ;;  %v158_v37 = vld [vmem:[#allocation5 + $0x120] sm:$0xff]  ;;  %v78_v38 = vld [vmem:[#allocation5 + $0x18] sm:$0xff] }
  0x1b   :  { %135 = vmatpush.msra.mxu1 %v124_v18  ;;  %v117_v39 = vld [vmem:[#allocation5 + $0x98] sm:$0xff]  ;;  %v77_v41 = vld [vmem:[#allocation5 + $0x10] sm:$0xff]  ;;  %v76_v44 = vld [vmem:[#allocation5 + $0x8] sm:$0xff] }
  0x1c   :  { %175 = vmatpush.msra.mxu2 %v164_v19  ;;  %97 = vmatpush.msra.mxu0 %v84_v20  ;;  %v157_v40 = vld [vmem:[#allocation5 + $0x118] sm:$0xff]  ;;  %v116_v42 = vld [vmem:[#allocation5 + $0x90] sm:$0xff]  ;;  %v115_v45 = vld [vmem:[#allocation5 + $0x88] sm:$0xff] }
  0x1d   :  { %136 = vmatpush.msra.mxu1 %v123_v21  ;;  %v156_v43 = vld [vmem:[#allocation5 + $0x110] sm:$0xff]  ;;  %v155_v46 = vld [vmem:[#allocation5 + $0x108] sm:$0xff]  ;;  %v75_v47 = vld [vmem:[#allocation5] sm:$0xff] }
  0x1e   :  { %176 = vmatpush.msra.mxu2 %v163_v22  ;;  %98 = vmatpush.msra.mxu0 %v83_v23  ;;  %v114_v48 = vld [vmem:[#allocation5 + $0x80] sm:$0xff] }
  0x1f   :  { %137 = vmatpush.msra.mxu1 %v122_v24  ;;  %v154_v49 = vld [vmem:[#allocation5 + $0x100] sm:$0xff] }
  0x20   :  { %177 = vmatpush.msra.mxu2 %v162_v25  ;;  %99 = vmatpush.msra.mxu0 %v82_v26  ;;  %v74_v60 = vld [vmem:[#allocation7] sm:$0x7] }
  0x21   :  { %138 = vmatpush.msra.mxu1 %v121_v27  ;;  %v111_v61 = vperm.slane %v74_v60, 0  ;;  %v150_v62 = vperm.slane %v74_v60, 1  ;;  %v190_v4 = vperm.slane %v74_v60, 2 }
  0x22   :  { %178 = vmatpush.msra.mxu2 %v161_v28  ;;  %100 = vmatpush.msra.mxu0 %v81_v29 }
  0x23   :  { %139 = vmatpush.msra.mxu1 %v120_v30 }
  0x24   :  { %179 = vmatpush.msra.mxu2 %v160_v31  ;;  %101 = vmatpush.msra.mxu0 %v80_v32 }
  0x25   :  { %140 = vmatpush.msra.mxu1 %v119_v33 }
  0x26   :  { %180 = vmatpush.msra.mxu2 %v159_v34  ;;  %102 = vmatpush.msra.mxu0 %v79_v35 }
  0x27   :  { %141 = vmatpush.msra.mxu1 %v118_v36 }
  0x28   :  { %181 = vmatpush.msra.mxu2 %v158_v37  ;;  %103 = vmatpush.msra.mxu0 %v78_v38 }
  0x29   :  { %142 = vmatpush.msra.mxu1 %v117_v39 }
  0x2a   :  { %182 = vmatpush.msra.mxu2 %v157_v40  ;;  %104 = vmatpush.msra.mxu0 %v77_v41 }
  0x2b   :  { %143 = vmatpush.msra.mxu1 %v116_v42 }
  0x2c   :  { %183 = vmatpush.msra.mxu2 %v156_v43  ;;  %105 = vmatpush.msra.mxu0 %v76_v44 }
  0x2d   :  { %144 = vmatpush.msra.mxu1 %v115_v45 }
  0x2e   :  { %184 = vmatpush.msra.mxu2 %v155_v46  ;;  %106 = vmatpush.msra.mxu0 %v75_v47 }
  0x2f   :  { %145 = vmatpush.msra.mxu1 %v114_v48 }
  0x30   :  { %185 = vmatpush.msra.mxu2 %v154_v49 }
  0x84   :  { %v61_v50 = vpop.xlane.xlu0 %60 }
  0x85   :  { %v62_v51 = vmax.f32 %v61_v50, 1e-24 }
  0x87   :  { %218 = vrsqrt.f32 %v62_v51  ;;  %vm69_vm1 = vweird.f32 %v62_v51 }
  0x8d   :  { %v219_v52 = vpop.eup %218 }
  0x8e   :  { %v64_v53 = vmul.f32 %v219_v52, %v62_v51  ;;  %vm70_vm0 = vweird.f32 %v219_v52 }
  0x8f   :  { %vm71_vm2 = vmor %vm69_vm1, %vm70_vm0 }
  0x90   :  { %v65_v54 = vmul.f32 %v219_v52, %v64_v53 }
  0x92   :  { %v66_v55 = vmul.f32 0.5, %v65_v54 }
  0x94   :  { %v67_v56 = vsub.f32 1.5, %v66_v55 }
  0x96   :  { %v68_v57 = vmul.f32 %v219_v52, %v67_v56 }
  0x98   :  { %v72_v58 = vsel %vm71_vm2, %v219_v52, %v68_v57 }
  0x99   :  { %v73_v59 = vmul.f32 %v72_v58, %v357_v0 }
  0x9b   :  { %107 = vmatmul.f32.vlgmr.msra.gmra.mxu0 %v73_v59  ;;  %146 = vmatmul.f32.vlgmr.msra.gmra.mxu1 %v73_v59 }
  0x9c   :  { %186 = vmatmul.f32.vlgmr.msra.gmra.mxu2 %v73_v59 }
 0x118   :  { %v108_v63 = vpop.f32.mrf.mxu0  ;;  %v147_v1 = vpop.f32.mrf.mxu1 }
 0x119   :  { %v112_v2 = vmul.f32 %v111_v61, %v108_v63  ;;  %v151_v3 = vmul.f32 %v150_v62, %v147_v1 }
 0x11b   :  { %v152_v6 = vmax.f32 %v112_v2, %v151_v3 }
 0x11f   :  { %v187_v5 = vpop.f32.mrf.mxu2 }
 0x120   :  { %v191_v0 = vmul.f32 %v190_v4, %v187_v5 }
 0x122   :  { %v192_v7 = vmax.f32 %v152_v6, %v191_v0 }
 0x124   :  { %193 = vst [vmem:[#allocation8] sm:$0xff] %v192_v7 }
 0x125   :  { %204 = dma.vmem_to_hbm [thread:$0]  %s200_s2, 128, %s202_s30, [#allocation4]  }
 0x126   :  { %320 = dma.done.wait [#allocation4], 128  }
 0x127   :  { %321 = vsyncadd [#allocation4], 4294967168 }
 0x128   :  { %209 = vsyncpa [#allocation3], 1 }
 0x129   :  { %210 = vsyncpa [#allocation6], 1 }
 0x12a   :  { %211 = vsyncpa [#allocation4], 1 }

</bundles_post_ra>
